<compile_context>
chip_gen: v5e
topology: v5e:2x2
jax: 0.10.0
libtpu: 0.0.40
codegen_flags: <defaults>
</compile_context>

<pallas_src>
import jax
import jax.numpy as jnp
import numpy as np
from jax.experimental import pallas as pl
from jax.experimental.pallas import tpu as pltpu


# ----------------------------- helpers (wrapper-side layout, plain XLA) -----------------------------
def _round_up(x, m):
    return ((x + m - 1) // m) * m


def maybe_pad(pixel_values, patch_size):
    """Right/bottom zero-pad H, W up to multiples of the patch size (matches nn.functional.pad order)."""
    ph, pw = patch_size
    _, _, H, W = pixel_values.shape
    pad_h = (-H) % ph
    pad_w = (-W) % pw
    if pad_h or pad_w:
        pixel_values = jnp.pad(pixel_values, ((0, 0), (0, 0), (0, pad_h), (0, pad_w)))
    return pixel_values


def extract_patches(pixel_values, patch_size):
    """(B, C, H, W) -> (B*Hp*Wp, C*ph*pw); patch flattening is channel-major, then kh, kw,
    matching Conv2d.weight.reshape(out, C*ph*pw)."""
    # TODO(synk): optional further win — move this im2col regrouping into the kernel via a
    # (1, C, rows*ph, W) BlockSpec on the raw NCHW input to avoid the materialized HBM copy.
    ph, pw = patch_size
    B, C, H, W = pixel_values.shape
    Hp, Wp = H // ph, W // pw
    x = pixel_values.reshape(B, C, Hp, ph, Wp, pw)
    x = x.transpose(0, 2, 4, 1, 3, 5)                       # (B, Hp, Wp, C, ph, pw)
    return x.reshape(B * Hp * Wp, C * ph * pw), (Hp, Wp)


# ----------------------------- Pallas kernel: patch projection matmul -----------------------------
def _patch_embed_kernel(p_ref, w_ref, b_ref, o_ref):
    # (TM, K) bf16 @ (K, N) bf16 -> f32 accumulation on the MXU, f32 bias add, cast at the store.
    acc = jnp.dot(p_ref[...], w_ref[...], preferred_element_type=jnp.float32)
    o_ref[...] = (acc + b_ref[...]).astype(o_ref.dtype)


def patch_embed_matmul(patches, w2d, bias_row, *, tm_cap=8192, out_dtype=jnp.bfloat16):
    """patches: (M, K) compute-dtype, w2d: (K, N) compute-dtype, bias_row: (1, N) f32 -> (M, N) out_dtype."""
    M, K = patches.shape
    N = w2d.shape[1]

    # Tile only M. Aim for >=2 grid steps (v7x megacore), cap the tile at tm_cap so
    # double-buffered patches+output stay well under scoped VMEM on all generations,
    # and round to 16 rows (bf16 packs 16 sublanes per vreg).
    TM = max(16, min(tm_cap, _round_up(pl.cdiv(M, 2), 16)))
    grid_m = pl.cdiv(M, TM)                                  # ragged last block is masked by Pallas

    return pl.pallas_call(
        _patch_embed_kernel,
        out_shape=jax.ShapeDtypeStruct((M, N), out_dtype),
        grid=(grid_m,),
        in_specs=[
            pl.BlockSpec((TM, K), lambda i: (i, 0)),         # patch rows (streamed along M)
            pl.BlockSpec((K, N), lambda i: (0, 0)),          # projection weight (grid-invariant, resident)
            pl.BlockSpec((1, N), lambda i: (0, 0)),          # bias (grid-invariant, resident)
        ],
        out_specs=pl.BlockSpec((TM, N), lambda i: (i, 0)),
        compiler_params=pltpu.CompilerParams(
            dimension_semantics=("parallel",),               # independent M tiles -> megacore sharding
        ),
    )(patches, w2d, bias_row)


# ----------------------------- ScOTPatchEmbeddings forward -----------------------------
def scot_patch_embeddings(pixel_values, conv_weight, conv_bias, patch_size,
                          compute_dtype=jnp.bfloat16, out_dtype=jnp.bfloat16):
    """pixel_values: (B, C, H, W); conv_weight: (hidden, C, ph, pw); conv_bias: (hidden,).
    Returns (embeddings (B, Hp*Wp, hidden) out_dtype, (Hp, Wp))."""
    ph, pw = patch_size
    B, C, H, W = pixel_values.shape
    hidden = conv_weight.shape[0]
    if conv_weight.shape[1] != C:
        raise ValueError("channel dimension of pixel values does not match configuration")

    # Cast first so the wrapper-side pad + im2col relayout (materialized by XLA) moves bf16, not f32.
    x = maybe_pad(pixel_values.astype(compute_dtype), patch_size)
    patches, (Hp, Wp) = extract_patches(x, patch_size)       # (B*Hp*Wp, C*ph*pw) compute-dtype

    # Conv2d(k=stride=patch) == matmul with the flattened conv weight.
    w2d = conv_weight.reshape(hidden, C * ph * pw).T.astype(compute_dtype)   # (K, N)
    bias_row = conv_bias.reshape(1, hidden).astype(jnp.float32)              # bias added in f32

    out2d = patch_embed_matmul(patches, w2d, bias_row, out_dtype=out_dtype)
    embeddings = out2d.reshape(B, Hp * Wp, hidden)            # == flatten(2).transpose(1, 2)
    return embeddings, (Hp, Wp)


# ----------------------------- main -----------------------------
if __name__ == "__main__":
    key = jax.random.PRNGKey(0)
    B, C, H, W = 2, 4, 16, 16
    patch = 4
    hidden = 48                                              # ScOT-T embed_dim

    k1, k2, k3, k4 = jax.random.split(key, 4)
    pixel_values = jax.random.normal(k1, (B, C, H, W), jnp.float32)
    conv_weight = 0.02 * jax.random.normal(k2, (hidden, C, patch, patch), jnp.float32)
    conv_bias = 0.02 * jax.random.normal(k3, (hidden,), jnp.float32)

    emb, out_dims = scot_patch_embeddings(pixel_values, conv_weight, conv_bias, (patch, patch))
    jax.block_until_ready(emb)

    Hp, Wp = H // patch, W // patch
    assert emb.shape == (B, Hp * Wp, hidden), emb.shape
    assert emb.dtype == jnp.bfloat16, emb.dtype
    assert out_dims == (Hp, Wp), out_dims
    assert bool(jnp.all(jnp.isfinite(emb.astype(jnp.float32))))

    # Numerical check against a reference at matching precision (bf16 inputs, f32 accumulation),
    # with tolerance for the bf16 output store.
    p_ref, _ = extract_patches(maybe_pad(pixel_values.astype(jnp.bfloat16), (patch, patch)),
                               (patch, patch))
    w_ref = conv_weight.reshape(hidden, -1).T
    ref = (p_ref.astype(jnp.float32) @ w_ref.astype(jnp.bfloat16).astype(jnp.float32)
           + conv_bias[None, :]).reshape(B, Hp * Wp, hidden)
    np.testing.assert_allclose(np.asarray(emb, dtype=np.float32), np.asarray(ref),
                               rtol=2e-2, atol=2e-2)

    # Exercise the maybe_pad path AND the ragged last M-block (H, W not multiples of patch_size).
    px2 = jax.random.normal(k4, (B, C, 18, 18), jnp.float32)
    emb2, out_dims2 = scot_patch_embeddings(px2, conv_weight, conv_bias, (patch, patch))
    jax.block_until_ready(emb2)
    assert emb2.shape == (B, 5 * 5, hidden), emb2.shape
    assert out_dims2 == (5, 5), out_dims2
    assert bool(jnp.all(jnp.isfinite(emb2.astype(jnp.float32))))

    # Ragged-block numerical check too (M = 50 not a multiple of TM).
    p_ref2, _ = extract_patches(maybe_pad(px2.astype(jnp.bfloat16), (patch, patch)), (patch, patch))
    ref2 = (p_ref2.astype(jnp.float32) @ w_ref.astype(jnp.bfloat16).astype(jnp.float32)
            + conv_bias[None, :]).reshape(B, 5 * 5, hidden)
    np.testing.assert_allclose(np.asarray(emb2, dtype=np.float32), np.asarray(ref2),
                               rtol=2e-2, atol=2e-2)

    print("KERNEL_OK")
</pallas_src>

<mosaic_0001>
module attributes {stable_mosaic.version = 11 : i64} {
  func.func @_patch_embed_kernel(%arg0: i32, %arg1: memref<16x64xbf16, #tpu.memory_space<vmem>>, %arg2: memref<64x48xbf16, #tpu.memory_space<vmem>>, %arg3: memref<1x48xf32, #tpu.memory_space<vmem>>, %arg4: memref<16x48xbf16, #tpu.memory_space<vmem>>) attributes {dimension_semantics = [#tpu.dimension_semantics<parallel>], iteration_bounds = array<i64: 2>, scalar_prefetch = 0 : i64, scratch_operands = 0 : i64, tpu.core_type = #tpu.core_type<tc>, window_params = [{transform_indices = @transform_0, window_bounds = array<i64: 16, 64>}, {pipeline_mode = #tpu.pipeline_mode<synchronous>, transform_indices = @transform_1, window_bounds = array<i64: 64, 48>}, {pipeline_mode = #tpu.pipeline_mode<synchronous>, transform_indices = @transform_2, window_bounds = array<i64: 1, 48>}, {transform_indices = @transform_3, window_bounds = array<i64: 16, 48>}]} {
    %c0 = arith.constant 0 : index
    %c0_0 = arith.constant 0 : index
    %0 = vector.load %arg1[%c0, %c0_0] : memref<16x64xbf16, #tpu.memory_space<vmem>>, vector<16x64xbf16>
    %c0_1 = arith.constant 0 : index
    %c0_2 = arith.constant 0 : index
    %1 = vector.load %arg2[%c0_1, %c0_2] : memref<64x48xbf16, #tpu.memory_space<vmem>>, vector<64x48xbf16>
    %cst = arith.constant dense<0.000000e+00> : vector<16x48xf32>
    %2 = tpu.matmul %0, %1, %cst {dimension_numbers = #tpu.dot_dimension_numbers<[1], [0], [0], [1], [0, 0, 1, 1], [], []>} : vector<16x64xbf16>, vector<64x48xbf16>, vector<16x48xf32> -> vector<16x48xf32>
    %c0_3 = arith.constant 0 : index
    %c0_4 = arith.constant 0 : index
    %3 = vector.load %arg3[%c0_3, %c0_4] : memref<1x48xf32, #tpu.memory_space<vmem>>, vector<1x48xf32>
    %4 = vector.broadcast %3 : vector<1x48xf32> to vector<16x48xf32>
    %5 = arith.addf %2, %4 : vector<16x48xf32>
    %6 = arith.truncf %5 : vector<16x48xf32> to vector<16x48xbf16>
    %c0_5 = arith.constant 0 : index
    %c0_6 = arith.constant 0 : index
    %7 = vector.load %arg4[%c0_5, %c0_6] : memref<16x48xbf16, #tpu.memory_space<vmem>>, vector<16x48xbf16>
    tpu.vector_store %arg4[%c0_5, %c0_6], %6 {strides = array<i32>} : memref<16x48xbf16, #tpu.memory_space<vmem>>, vector<16x48xbf16>,
    return
  }
  func.func @transform_0(%arg0: i32) -> (i32, i32) {
    %c0_i32 = arith.constant 0 : i32
    %c0_i32_0 = arith.constant 0 : i32
    return %arg0, %c0_i32 : i32, i32
  }
  func.func @transform_1(%arg0: i32) -> (i32, i32) {
    %c0_i32 = arith.constant 0 : i32
    %c0_i32_0 = arith.constant 0 : i32
    %c0_i32_1 = arith.constant 0 : i32
    return %c0_i32, %c0_i32_0 : i32, i32
  }
  func.func @transform_2(%arg0: i32) -> (i32, i32) {
    %c0_i32 = arith.constant 0 : i32
    %c0_i32_0 = arith.constant 0 : i32
    %c0_i32_1 = arith.constant 0 : i32
    return %c0_i32, %c0_i32_0 : i32, i32
  }
  func.func @transform_3(%arg0: i32) -> (i32, i32) {
    %c0_i32 = arith.constant 0 : i32
    %c0_i32_0 = arith.constant 0 : i32
    return %arg0, %c0_i32 : i32, i32
  }
}

</mosaic_0001>

<bundles_post_ra>
// kernel: tpu_custom_call.1
= control target key start
LH: loop header
LB: loop body
LE: loop exit
PB: predicated region body
PF: predicated region fallthrough
CT: control target
= control target key end

     0   :  { %8 = vsyncpa [#allocation3], 0  ;;  %s583_s0 = inlined_call_operand.vmem [shape: bf16[32,64], index: 0, kind: input, shape index: {}]   ;;  %s584_s1 = inlined_call_operand.vmem [shape: bf16[64,48], index: 1, kind: input, shape index: {}]   ;;  %s585_s2 = inlined_call_operand.vmem [shape: f32[1,48], index: 2, kind: input, shape index: {}]   ;;  %s586_s3 = inlined_call_operand.hbm [shape: bf16[32,48], index: 3, kind: output, shape index: {}]  }
   0x1   :  { %10 = vsyncpa [#allocation3 + $0x1], 0  ;;  %s484_s12 = smov 0   ;;  %s486_s13 = smov 0  }
   0x2   :  { %s488_s14 = smov 0   ;;  %s490_s15 = smov 0  }
   0x3 LB: > { %s505_s16 = sadd.s32 4294967295, %s460_s15   ;;  %s317_s17 = sadd.s32 4294967294, %s460_s15   ;;  %s460_s15 = sphi %s490_s15, %s592_s15   ;;  %s456_s14 = sphi %s488_s14, %s591_s14   ;;  %s452_s13 = sphi %s486_s13, %s590_s13   ;;  %s448_s12 = sphi %s484_s12, %s589_s12  }
   0x4   : > { %s509_s18 = sadd.s32 1, %s460_s15   ;;  %s91_s19 = sadd.s32 1, %s456_s14 }
   0x5   : > { %s88_s20 = ssub.s32 %s460_s15, %s509_s18  ;;  %p101_p0 = scmp.ne.s32.totalorder %s456_s14, %s452_s13 }
   0x6   : > { %p89_p1 = scmp.eq.s32.totalorder %s88_s20, 0  ;;  %p102_p2 = scmp.eq.s32.totalorder %s505_s16, 1 }
   0x7   : > { %p107_p3 = scmp.ne.s32.totalorder %s452_s13, %s448_s12  ;;  %p108_p4 = scmp.eq.s32.totalorder %s317_s17, 1 }
   0x8   : > { %s520_s21 = scalar_select %p89_p1, %s456_s14, %s91_s19  }
   0x9   : > { %p522_p5 = por %p102_p2, %p101_p0  ;;  %p526_p6 = por %p108_p4, %p107_p3 }
   0xa   : > { %p320_p7 = scmp.ge.s32.totalorder %s460_s15, 1  ;;  %p141_p8 = scmp.lt.s32.totalorder %s460_s15, 3 }
   0xc   : > { %p142_p9 = pnand %p320_p7, %p141_p8 }
   0xd   : > { %s322_s26 = sshll.u32 (!%p142_p9), %s505_s16, 1  ;;  %s162_s10 = sand.u32 (!%p142_p9), 1, %s452_s13  }
   0xe   : > { %145 = sbr.rel (%p142_p9) target bundleno = 177 (0xb1), region = 32  ;;  %p166_p10 = scmp.lt.s32.totalorder (!%p142_p9), %s322_s26, 3 }
   0xf   : > { %s321_s19 = sshll.u32 (!%p142_p9), %s162_s10, 3  ;;  %s355_s20 = sshll.u32 (!%p142_p9), %s505_s16, 3 }
  0x10   : > { %s164_s27 = scalar_lea.vmem (!%p142_p9), [#allocation2], %s321_s19  ;;  %s240_s30 = scalar_lea.sflag (!%p142_p9), [#allocation3], %s162_s10 }
  0x11   : > { %s252_s28 = sshll.u32 (!%p142_p9), %s164_s27, 4  ;;  %s418_s7 = scalar_lea.hbm (!%p142_p9), %s586_s3, 16  ;;  %s253_s28 = int_to_ptr.vmem [resolvable:$true] %s252_s28 }
  0x13   : > { %v354_v0 = vld [vmem:[%s584_s1 + $0x18] sm:$0xff]  ;;  %v353_v1 = vld [vmem:[%s584_s1 + $0x10] sm:$0xff]  ;;  %s594_s26 = smov (!%p166_p10, %s322_s26), 3  ;;  %v352_v2 = vld [vmem:[%s584_s1 + $0x8] sm:$0xff]  ;;  %vm216_vm0 = vcmask 523264   ;;  %vm236_vm1 = vcmask 388096  }
  0x14   : > { %224 = vmatpush.bf16.msra.mxu0 %v354_v0  ;;  %s323_s4 = sshll.u32 %s594_s26, 2  ;;  %v351_v3 = vld [vmem:[%s584_s1] sm:$0xff]  ;;  %s251_s26 = scalar_lea.hbm %s586_s3, %s355_s20 }
  0x15   : > { %s169_s9 = scalar_lea.vmem %s583_s0, %s323_s4  ;;  %v397_v5 = vld [vmem:[%s585_s2] ss:$0 sm:$0xff]  ;;  %s254_s29 = sshll.u32 %s251_s26, 4  ;;  %s255_s29 = int_to_ptr.hbm [resolvable:$true] %s254_s29 }
  0x16   : > { %v350_v4 = vld [vmem:[%s169_s9] sm:$0xff]  ;;  %s412_s4 = sshra.s32 %s255_s29, 4  ;;  %s413_s4 = int_to_ptr.hbm [resolvable:$true] %s412_s4 }
  0x17   : > { %s414_s16 = scalar_lea.hbm %s413_s4, 8  ;;  %p419_p0 = scmp.lt.s32.totalorder %s413_s4, %s586_s3 }
  0x18   : > { %225 = vmatpush.bf16.msra.mxu0 %v353_v1  ;;  %p415_p11 = scmp.ne.s32.totalorder %s413_s4, %s414_s16  ;;  %p420_p1 = scmp.lt.s32.totalorder %s418_s7, %s414_s16 }
  0x1a   : > { %p416_p12 = pnand %p415_p11, %p522_p5  ;;  %p421_p2 = por %p420_p1, %p419_p0 }
  0x1c   : > { %226 = vmatpush.bf16.msra.mxu0 %v352_v2  ;;  %p417_p13 = pneg %p416_p12 }
  0x1e   : > { %p422_p3 = pnand %p421_p2, %p417_p13 }
  0x20   : > { %227 = vmatpush.bf16.msra.mxu0 %v351_v3 }
  0x23   : > { %344 = vmatmul.msk.bf16.vlgmr.msra.gmra.mxu0 %vm216_vm0, %v350_v4 }
  0xa0   : > { %v229_v6 = vpop.f32.mrf.mxu0 }
  0xa1   : > { %v230_v7 = vadd.f32 %v397_v5, %v229_v6 }
  0xa3   : > { %v234_v8 = vpack.c.bf16 %v230_v7, %v230_v7 }
  0xa5   : > { %237 = vst.msk [vmem:[%s164_s27] sm:$0xf] %vm236_vm1, %v234_v8 }
  0xa8   : > { %v231_v9 = vpop.f32.mrf.mxu0 }
  0xa9   : > { %v232_v10 = vadd.f32 %v397_v5, %v231_v9 }
  0xab   : > { %v235_v11 = vpack.c.bf16 %v232_v10, %v232_v10 }
  0xad   : > { %238 = vst.msk [vmem:[%s164_s27 + $0x4] sm:$0xf] %vm236_vm1, %v235_v11 }
  0xae   : > { %425 = shalt.err (!%p422_p3)
}
  0xaf   : > { %s462_s10 = smov 64   ;;  %s463_s11 = smov 4  }
  0xb0   : > { %356 = dma.vmem_to_hbm [thread:$0]  (%p522_p5), %s253_s28, 128, %s255_s29, %s240_s30, %s462_s10, %s462_s10, %s463_s11  }
  0xb1 PF: > { %p362_p4 = scmp.ge.s32.totalorder %s460_s15, 2  ;;  %s269_s17 = sand.u32 1, %s448_s12  }
  0xb2   : > { %s270_s19 = scalar_lea.sflag [#allocation3], %s269_s17 }
  0xb3   : > { %p359_p7 = pnand %p362_p4, %p526_p6 }
  0xb5   : > { %p360_p8 = pneg %p359_p7 }
  0xb7   : > { %443 = dma.done.wait (%p360_p8), %s270_s19, 128  }
  0xb8   : > { %445 = vsyncadd (%p360_p8), %s270_s19, 4294967168  ;;  %p13_p9 = scmp.ge.s32.totalorder %s509_s18, 4   ;;  %s589_s12 = smov %s452_s13 }
  0xb9   : > { %s590_s13 = smov %s456_s14  ;;  %s591_s14 = smov %s520_s21 }
  0xba   : > { %s592_s15 = smov %s509_s18  ;;  %15 = sbr.rel (!%p13_p9) target bundleno = 3 (0x3), region = 67 }
  0xbf   :  { %276 = vsyncpa [#allocation3], 1 }
  0xc0   :  { %278 = vsyncpa [#allocation3 + $0x1], 1 }

</bundles_post_ra>
